<compile_context>
chip_gen: v7x
topology: tpu7x:2x2x1
jax: 0.10.0
libtpu: 0.0.40
codegen_flags: <defaults>
</compile_context>

<pallas_src>
import jax
import jax.numpy as jnp
from jax.experimental import pallas as pl
from jax.experimental.pallas import tpu as pltpu

_EPS = 1e-5


def _round_up(x, m):
    return (x + m - 1) // m * m


def _fold_bn_into_conv(w, b, gamma, beta, mean, var):
    # w: (C_out, C_in, K); b, gamma, beta, mean, var: (C_out,)
    scale = gamma / jnp.sqrt(var + _EPS)
    return w * scale[:, None, None], (b - mean) * scale + beta


# ----------------------------------------------------------------------------
# Wrapper: parameter folding / padding / layout, then pallas_call.
# ----------------------------------------------------------------------------
def resblock_forward(x_ncl, p, *, lt_max=512):
    """x_ncl: (N, C_in, L) float32 (PyTorch Conv1d layout). Returns (N, C_out, L) f32."""
    N, C_in, L = x_ncl.shape
    C_out = p["w1"].shape[0]

    Cin_p = _round_up(C_in, 128)           # lane-dense K for conv1 / skip
    Cout_p = _round_up(C_out, 128)         # lane-dense N (and K for conv2)
    LT = min(lt_max, _round_up(L, 8))      # length-tile rows per grid step
    T = (L + LT - 1) // LT
    Lp = T * LT

    # ---- fold BN1/BN2 into conv1/conv2; BN3 -> elementwise scale/bias -------
    w1f, b1f = _fold_bn_into_conv(p["w1"], p["b1"], p["g1"], p["be1"], p["m1"], p["v1"])
    w2f, b2f = _fold_bn_into_conv(p["w2"], p["b2"], p["g2"], p["be2"], p["m2"], p["v2"])
    sc3 = p["g3"] / jnp.sqrt(p["v3"] + _EPS)
    bi3 = p["be3"] - p["m3"] * sc3

    # ---- channels-last weights, padded to lane multiples, cast to bf16 ------
    w1k = jnp.transpose(w1f, (2, 1, 0))                 # (3, C_in, C_out)
    w2k = jnp.transpose(w2f, (2, 1, 0))                 # (3, C_out, C_out)
    wsk = jnp.transpose(p["ws"][:, :, 0], (1, 0))       # (C_in, C_out)
    w1k = jnp.pad(w1k, ((0, 0), (0, Cin_p - C_in), (0, Cout_p - C_out)))
    w2k = jnp.pad(w2k, ((0, 0), (0, Cout_p - C_out), (0, Cout_p - C_out)))
    wsk = jnp.pad(wsk, ((0, Cin_p - C_in), (0, Cout_p - C_out)))

    wa = w1k[0].astype(jnp.bfloat16)                                   # conv1 tap 0
    wb = jnp.concatenate([w1k[1], wsk], axis=1).astype(jnp.bfloat16)   # conv1 tap 1 | skip 1x1
    wc = w1k[2].astype(jnp.bfloat16)                                   # conv1 tap 2
    w2b = w2k.astype(jnp.bfloat16)                                     # conv2 taps

    def _vec(v):
        return jnp.pad(v, (0, Cout_p - C_out)).reshape(1, Cout_p).astype(jnp.float32)

    b1v, b2v, bsv, sc3v, bi3v = _vec(b1f), _vec(b2f), _vec(p["bs"]), _vec(sc3), _vec(bi3)

    # ---- input: NCL -> NLC, pad channels, 2-row halos + tail, cast bf16 -----
    x_nlc = jnp.transpose(x_ncl, (0, 2, 1)).astype(jnp.float32)
    x_pad = jnp.pad(x_nlc, ((0, 0), (2, Lp - L + 2), (0, Cin_p - C_in))).astype(jnp.bfloat16)
    # overlapping length tiles with a 2-row halo on each side: (N, T, LT+4, Cin_p)
    xh = jnp.stack([x_pad[:, t * LT: t * LT + LT + 4, :] for t in range(T)], axis=1)

    # ------------------------------------------------------------------------
    def kernel(xh_ref,                        # (LT+4, Cin_p)   bf16 haloed input tile
               wa_ref, wb_ref, wc_ref,        # conv1 taps (tap1 fused with skip)
               w2_ref,                        # (3, Cout_p, Cout_p) conv2 taps
               b1_ref, bs_ref, b2_ref, sc3_ref, bi3_ref,   # (1, Cout_p) f32
               out_ref):                      # (LT, Cout_p) f32
        t = pl.program_id(1)
        xh_t = xh_ref[...]                                            # (LT+4, Cin_p)

        # conv1 (k=3, folded BN1) over LT+2 extended rows; the 1x1 skip conv is
        # fused into the center-tap matmul as extra output columns.
        cb = jnp.dot(xh_t[1:LT + 3], wb_ref[...],
                     preferred_element_type=jnp.float32)              # (LT+2, 2*Cout_p)
        h1 = (jnp.dot(xh_t[0:LT + 2], wa_ref[...], preferred_element_type=jnp.float32)
              + cb[:, :Cout_p]
              + jnp.dot(xh_t[2:LT + 4], wc_ref[...], preferred_element_type=jnp.float32)
              + b1_ref[...])
        h1 = jnp.maximum(h1, 0.0)

        # Rows whose global position is outside [0, L) must be exactly zero
        # (that is conv2's zero padding), not conv1-of-zero-padded-input.
        # Iota mask instead of a zeroed VMEM scratch round-trip.
        g = t * LT - 1 + jax.lax.broadcasted_iota(jnp.int32, (LT + 2, 1), 0)
        h1 = jnp.where((g >= 0) & (g < L), h1, 0.0).astype(jnp.bfloat16)

        # conv2 (k=3, folded BN2) + ReLU -> LT rows
        w2 = w2_ref[...]
        h2 = (jnp.dot(h1[0:LT], w2[0], preferred_element_type=jnp.float32)
              + jnp.dot(h1[1:LT + 1], w2[1], preferred_element_type=jnp.float32)
              + jnp.dot(h1[2:LT + 2], w2[2], preferred_element_type=jnp.float32)
              + b2_ref[...])
        h2 = jnp.maximum(h2, 0.0)

        # skip path = second half of the fused center-tap matmul (center rows)
        s = cb[1:LT + 1, Cout_p:] + bs_ref[...]

        # residual add, BN3 scale/bias, final ReLU; lane-dense unmasked store
        y = (h2 + s) * sc3_ref[...] + bi3_ref[...]
        out_ref[...] = jnp.maximum(y, 0.0)

    out = pl.pallas_call(
        kernel,
        out_shape=jax.ShapeDtypeStruct((N, T, LT, Cout_p), jnp.float32),
        grid_spec=pltpu.PrefetchScalarGridSpec(
            num_scalar_prefetch=0,
            grid=(N, T),
            in_specs=[
                pl.BlockSpec((None, None, LT + 4, Cin_p), lambda n, t: (n, t, 0, 0)),  # xh
                pl.BlockSpec((Cin_p, Cout_p),             lambda n, t: (0, 0)),        # wa
                pl.BlockSpec((Cin_p, 2 * Cout_p),         lambda n, t: (0, 0)),        # wb (tap1|skip)
                pl.BlockSpec((Cin_p, Cout_p),             lambda n, t: (0, 0)),        # wc
                pl.BlockSpec((3, Cout_p, Cout_p),         lambda n, t: (0, 0, 0)),     # w2
                pl.BlockSpec((1, Cout_p),                 lambda n, t: (0, 0)),        # b1
                pl.BlockSpec((1, Cout_p),                 lambda n, t: (0, 0)),        # bs
                pl.BlockSpec((1, Cout_p),                 lambda n, t: (0, 0)),        # b2
                pl.BlockSpec((1, Cout_p),                 lambda n, t: (0, 0)),        # scale3
                pl.BlockSpec((1, Cout_p),                 lambda n, t: (0, 0)),        # bias3
            ],
            out_specs=pl.BlockSpec((None, None, LT, Cout_p), lambda n, t: (n, t, 0, 0)),
        ),
        compiler_params=pltpu.CompilerParams(
            dimension_semantics=("parallel", "parallel"),
            vmem_limit_bytes=32 * 1024 * 1024),
    )(xh, wa, wb, wc, w2b, b1v, bsv, b2v, sc3v, bi3v)

    y = out.reshape(N, Lp, Cout_p)[:, :L, :C_out]
    return jnp.transpose(y, (0, 2, 1))            # back to (N, C_out, L)


# ----------------------------------------------------------------------------
# Pure-JAX f32 reference (mirrors the PyTorch module in eval mode).
# ----------------------------------------------------------------------------
def resblock_reference(x, p):
    def conv1d(x, w, b, pad):
        y = jax.lax.conv_general_dilated(
            x, w, window_strides=(1,), padding=[(pad, pad)],
            dimension_numbers=("NCH", "OIH", "NCH"))
        return y + b[None, :, None]

    def bn(x, g, be, m, v):
        return (x - m[None, :, None]) / jnp.sqrt(v[None, :, None] + _EPS) \
            * g[None, :, None] + be[None, :, None]

    h = jax.nn.relu(bn(conv1d(x, p["w1"], p["b1"], 1), p["g1"], p["be1"], p["m1"], p["v1"]))
    h = jax.nn.relu(bn(conv1d(h, p["w2"], p["b2"], 1), p["g2"], p["be2"], p["m2"], p["v2"]))
    s = conv1d(x, p["ws"], p["bs"], 0)
    return jax.nn.relu(bn(h + s, p["g3"], p["be3"], p["m3"], p["v3"]))


# ----------------------------------------------------------------------------
def make_params(key, c_in, c_out):
    ks = jax.random.split(key, 16)
    u = lambda k, shape, s=0.3: jax.random.uniform(k, shape, jnp.float32, -s, s)
    return {
        # conv1 / conv2 / skip
        "w1": u(ks[0], (c_out, c_in, 3)), "b1": u(ks[1], (c_out,)),
        "w2": u(ks[2], (c_out, c_out, 3)), "b2": u(ks[3], (c_out,)),
        "ws": u(ks[4], (c_out, c_in, 1)), "bs": u(ks[5], (c_out,)),
        # BN1 / BN2 / BN3 (gamma, beta, running_mean, running_var)
        "g1": 1.0 + u(ks[6], (c_out,)), "be1": u(ks[7], (c_out,)),
        "m1": u(ks[8], (c_out,)),
        "v1": 0.5 + jax.random.uniform(ks[9], (c_out,), jnp.float32, 0.0, 1.0),
        "g2": 1.0 + u(ks[10], (c_out,)), "be2": u(ks[11], (c_out,)),
        "m2": u(ks[12], (c_out,)),
        "v2": 0.5 + jax.random.uniform(ks[13], (c_out,), jnp.float32, 0.0, 1.0),
        "g3": 1.0 + u(ks[14], (c_out,)), "be3": u(ks[15], (c_out,)),
        "m3": jnp.linspace(-0.1, 0.1, c_out, dtype=jnp.float32),
        "v3": jnp.linspace(0.8, 1.2, c_out, dtype=jnp.float32),
    }


if __name__ == "__main__":
    key = jax.random.PRNGKey(0)
    k_x, k_p = jax.random.split(key)

    N, C_IN, C_OUT, L = 2, 4, 8, 16
    x = jax.random.normal(k_x, (N, C_IN, L), dtype=jnp.float32)   # PyTorch NCL layout
    params = make_params(k_p, C_IN, C_OUT)

    y_kernel = jax.block_until_ready(resblock_forward(x, params))
    y_ref = jax.block_until_ready(resblock_reference(x, params))

    assert y_kernel.shape == (N, C_OUT, L)
    max_err = float(jnp.max(jnp.abs(y_kernel - y_ref)))
    # bf16 MXU operands (f32 accumulation) -> looser tolerance than pure f32.
    assert max_err < 8e-2, "max abs err %e" % max_err
    print("KERNEL_OK")
</pallas_src>

<mosaic_0001>
module attributes {stable_mosaic.version = 11 : i64} {
  func.func @kernel(%arg0: i32, %arg1: i32, %arg2: memref<1x1x20x128xbf16, #tpu.memory_space<vmem>>, %arg3: memref<128x128xbf16, #tpu.memory_space<vmem>>, %arg4: memref<128x256xbf16, #tpu.memory_space<vmem>>, %arg5: memref<128x128xbf16, #tpu.memory_space<vmem>>, %arg6: memref<3x128x128xbf16, #tpu.memory_space<vmem>>, %arg7: memref<1x128xf32, #tpu.memory_space<vmem>>, %arg8: memref<1x128xf32, #tpu.memory_space<vmem>>, %arg9: memref<1x128xf32, #tpu.memory_space<vmem>>, %arg10: memref<1x128xf32, #tpu.memory_space<vmem>>, %arg11: memref<1x128xf32, #tpu.memory_space<vmem>>, %arg12: memref<1x1x16x128xf32, #tpu.memory_space<vmem>>) attributes {dimension_semantics = [#tpu.dimension_semantics<parallel>, #tpu.dimension_semantics<parallel>], iteration_bounds = array<i64: 2, 1>, scalar_prefetch = 0 : i64, scratch_operands = 0 : i64, tpu.core_type = #tpu.core_type<tc>, window_params = [{transform_indices = @transform_0, window_bounds = array<i64: 1, 1, 20, 128>}, {pipeline_mode = #tpu.pipeline_mode<synchronous>, transform_indices = @transform_1, window_bounds = array<i64: 128, 128>}, {pipeline_mode = #tpu.pipeline_mode<synchronous>, transform_indices = @transform_2, window_bounds = array<i64: 128, 256>}, {pipeline_mode = #tpu.pipeline_mode<synchronous>, transform_indices = @transform_3, window_bounds = array<i64: 128, 128>}, {pipeline_mode = #tpu.pipeline_mode<synchronous>, transform_indices = @transform_4, window_bounds = array<i64: 3, 128, 128>}, {pipeline_mode = #tpu.pipeline_mode<synchronous>, transform_indices = @transform_5, window_bounds = array<i64: 1, 128>}, {pipeline_mode = #tpu.pipeline_mode<synchronous>, transform_indices = @transform_6, window_bounds = array<i64: 1, 128>}, {pipeline_mode = #tpu.pipeline_mode<synchronous>, transform_indices = @transform_7, window_bounds = array<i64: 1, 128>}, {pipeline_mode = #tpu.pipeline_mode<synchronous>, transform_indices = @transform_8, window_bounds = array<i64: 1, 128>}, {pipeline_mode = #tpu.pipeline_mode<synchronous>, transform_indices = @transform_9, window_bounds = array<i64: 1, 128>}, {transform_indices = @transform_10, window_bounds = array<i64: 1, 1, 16, 128>}]} {
    %c0 = arith.constant 0 : index
    %c0_0 = arith.constant 0 : index
    %c0_1 = arith.constant 0 : index
    %c0_2 = arith.constant 0 : index
    %0 = vector.load %arg2[%c0, %c0_0, %c0_1, %c0_2] : memref<1x1x20x128xbf16, #tpu.memory_space<vmem>>, vector<1x1x20x128xbf16>
    %1 = vector.shape_cast %0 : vector<1x1x20x128xbf16> to vector<20x128xbf16>
    %2 = vector.extract_strided_slice %1 {offsets = [1, 0], sizes = [18, 128], strides = [1, 1]} : vector<20x128xbf16> to vector<18x128xbf16>
    %c0_3 = arith.constant 0 : index
    %c0_4 = arith.constant 0 : index
    %3 = vector.load %arg4[%c0_3, %c0_4] : memref<128x256xbf16, #tpu.memory_space<vmem>>, vector<128x256xbf16>
    %cst = arith.constant dense<0.000000e+00> : vector<18x256xf32>
    %4 = tpu.matmul %2, %3, %cst {dimension_numbers = #tpu.dot_dimension_numbers<[1], [0], [0], [1], [0, 0, 1, 1], [], []>} : vector<18x128xbf16>, vector<128x256xbf16>, vector<18x256xf32> -> vector<18x256xf32>
    %5 = vector.extract_strided_slice %1 {offsets = [0, 0], sizes = [18, 128], strides = [1, 1]} : vector<20x128xbf16> to vector<18x128xbf16>
    %c0_5 = arith.constant 0 : index
    %c0_6 = arith.constant 0 : index
    %6 = vector.load %arg3[%c0_5, %c0_6] : memref<128x128xbf16, #tpu.memory_space<vmem>>, vector<128x128xbf16>
    %cst_7 = arith.constant dense<0.000000e+00> : vector<18x128xf32>
    %7 = tpu.matmul %5, %6, %cst_7 {dimension_numbers = #tpu.dot_dimension_numbers<[1], [0], [0], [1], [0, 0, 1, 1], [], []>} : vector<18x128xbf16>, vector<128x128xbf16>, vector<18x128xf32> -> vector<18x128xf32>
    %8 = vector.extract_strided_slice %4 {offsets = [0, 0], sizes = [18, 128], strides = [1, 1]} : vector<18x256xf32> to vector<18x128xf32>
    %9 = arith.addf %7, %8 : vector<18x128xf32>
    %10 = vector.extract_strided_slice %1 {offsets = [2, 0], sizes = [18, 128], strides = [1, 1]} : vector<20x128xbf16> to vector<18x128xbf16>
    %c0_8 = arith.constant 0 : index
    %c0_9 = arith.constant 0 : index
    %11 = vector.load %arg5[%c0_8, %c0_9] : memref<128x128xbf16, #tpu.memory_space<vmem>>, vector<128x128xbf16>
    %cst_10 = arith.constant dense<0.000000e+00> : vector<18x128xf32>
    %12 = tpu.matmul %10, %11, %cst_10 {dimension_numbers = #tpu.dot_dimension_numbers<[1], [0], [0], [1], [0, 0, 1, 1], [], []>} : vector<18x128xbf16>, vector<128x128xbf16>, vector<18x128xf32> -> vector<18x128xf32>
    %13 = arith.addf %9, %12 : vector<18x128xf32>
    %c0_11 = arith.constant 0 : index
    %c0_12 = arith.constant 0 : index
    %14 = vector.load %arg7[%c0_11, %c0_12] : memref<1x128xf32, #tpu.memory_space<vmem>>, vector<1x128xf32>
    %15 = vector.broadcast %14 : vector<1x128xf32> to vector<18x128xf32>
    %16 = arith.addf %13, %15 : vector<18x128xf32>
    %cst_13 = arith.constant 0.000000e+00 : f32
    %17 = vector.broadcast %cst_13 : f32 to vector<18x128xf32>
    %18 = arith.maximumf %16, %17 : vector<18x128xf32>
    %c16_i32 = arith.constant 16 : i32
    %19 = arith.muli %arg1, %c16_i32 : i32
    %c1_i32 = arith.constant 1 : i32
    %20 = arith.subi %19, %c1_i32 : i32
    %21 = tpu.iota {dimensions = array<i32: 0>} : vector<18x1xi32>
    %22 = vector.broadcast %20 : i32 to vector<18x1xi32>
    %23 = arith.addi %22, %21 : vector<18x1xi32>
    %c0_i32 = arith.constant 0 : i32
    %24 = vector.broadcast %c0_i32 : i32 to vector<18x1xi32>
    %25 = arith.cmpi sge, %23, %24 : vector<18x1xi32>
    %c16_i32_14 = arith.constant 16 : i32
    %26 = vector.broadcast %c16_i32_14 : i32 to vector<18x1xi32>
    %27 = arith.cmpi slt, %23, %26 : vector<18x1xi32>
    %28 = arith.andi %25, %27 : vector<18x1xi1>
    %cst_15 = arith.constant 0.000000e+00 : f32
    %29 = vector.shape_cast %28 : vector<18x1xi1> to vector<18x1xi1>
    %30 = vector.broadcast %29 : vector<18x1xi1> to vector<18x128xi1>
    %31 = vector.broadcast %cst_15 : f32 to vector<18x128xf32>
    %32 = arith.select %30, %18, %31 : vector<18x128xi1>, vector<18x128xf32>
    %33 = arith.truncf %32 : vector<18x128xf32> to vector<18x128xbf16>
    %c0_16 = arith.constant 0 : index
    %c0_17 = arith.constant 0 : index
    %c0_18 = arith.constant 0 : index
    %34 = vector.load %arg6[%c0_16, %c0_17, %c0_18] : memref<3x128x128xbf16, #tpu.memory_space<vmem>>, vector<3x128x128xbf16>
    %35 = vector.extract_strided_slice %33 {offsets = [0, 0], sizes = [16, 128], strides = [1, 1]} : vector<18x128xbf16> to vector<16x128xbf16>
    %36 = vector.extract_strided_slice %34 {offsets = [0, 0, 0], sizes = [1, 128, 128], strides = [1, 1, 1]} : vector<3x128x128xbf16> to vector<1x128x128xbf16>
    %37 = vector.shape_cast %36 : vector<1x128x128xbf16> to vector<128x128xbf16>
    %cst_19 = arith.constant dense<0.000000e+00> : vector<16x128xf32>
    %38 = tpu.matmul %35, %37, %cst_19 {dimension_numbers = #tpu.dot_dimension_numbers<[1], [0], [0], [1], [0, 0, 1, 1], [], []>} : vector<16x128xbf16>, vector<128x128xbf16>, vector<16x128xf32> -> vector<16x128xf32>
    %39 = vector.extract_strided_slice %33 {offsets = [1, 0], sizes = [16, 128], strides = [1, 1]} : vector<18x128xbf16> to vector<16x128xbf16>
    %40 = vector.extract_strided_slice %34 {offsets = [1, 0, 0], sizes = [1, 128, 128], strides = [1, 1, 1]} : vector<3x128x128xbf16> to vector<1x128x128xbf16>
    %41 = vector.shape_cast %40 : vector<1x128x128xbf16> to vector<128x128xbf16>
    %cst_20 = arith.constant dense<0.000000e+00> : vector<16x128xf32>
    %42 = tpu.matmul %39, %41, %cst_20 {dimension_numbers = #tpu.dot_dimension_numbers<[1], [0], [0], [1], [0, 0, 1, 1], [], []>} : vector<16x128xbf16>, vector<128x128xbf16>, vector<16x128xf32> -> vector<16x128xf32>
    %43 = arith.addf %38, %42 : vector<16x128xf32>
    %44 = vector.extract_strided_slice %33 {offsets = [2, 0], sizes = [16, 128], strides = [1, 1]} : vector<18x128xbf16> to vector<16x128xbf16>
    %45 = vector.extract_strided_slice %34 {offsets = [2, 0, 0], sizes = [1, 128, 128], strides = [1, 1, 1]} : vector<3x128x128xbf16> to vector<1x128x128xbf16>
    %46 = vector.shape_cast %45 : vector<1x128x128xbf16> to vector<128x128xbf16>
    %cst_21 = arith.constant dense<0.000000e+00> : vector<16x128xf32>
    %47 = tpu.matmul %44, %46, %cst_21 {dimension_numbers = #tpu.dot_dimension_numbers<[1], [0], [0], [1], [0, 0, 1, 1], [], []>} : vector<16x128xbf16>, vector<128x128xbf16>, vector<16x128xf32> -> vector<16x128xf32>
    %48 = arith.addf %43, %47 : vector<16x128xf32>
    %c0_22 = arith.constant 0 : index
    %c0_23 = arith.constant 0 : index
    %49 = vector.load %arg9[%c0_22, %c0_23] : memref<1x128xf32, #tpu.memory_space<vmem>>, vector<1x128xf32>
    %50 = vector.broadcast %49 : vector<1x128xf32> to vector<16x128xf32>
    %51 = arith.addf %48, %50 : vector<16x128xf32>
    %cst_24 = arith.constant 0.000000e+00 : f32
    %52 = vector.broadcast %cst_24 : f32 to vector<16x128xf32>
    %53 = arith.maximumf %51, %52 : vector<16x128xf32>
    %54 = vector.extract_strided_slice %4 {offsets = [1, 128], sizes = [16, 128], strides = [1, 1]} : vector<18x256xf32> to vector<16x128xf32>
    %c0_25 = arith.constant 0 : index
    %c0_26 = arith.constant 0 : index
    %55 = vector.load %arg8[%c0_25, %c0_26] : memref<1x128xf32, #tpu.memory_space<vmem>>, vector<1x128xf32>
    %56 = vector.broadcast %55 : vector<1x128xf32> to vector<16x128xf32>
    %57 = arith.addf %54, %56 : vector<16x128xf32>
    %58 = arith.addf %53, %57 : vector<16x128xf32>
    %c0_27 = arith.constant 0 : index
    %c0_28 = arith.constant 0 : index
    %59 = vector.load %arg10[%c0_27, %c0_28] : memref<1x128xf32, #tpu.memory_space<vmem>>, vector<1x128xf32>
    %60 = vector.broadcast %59 : vector<1x128xf32> to vector<16x128xf32>
    %61 = arith.mulf %58, %60 : vector<16x128xf32>
    %c0_29 = arith.constant 0 : index
    %c0_30 = arith.constant 0 : index
    %62 = vector.load %arg11[%c0_29, %c0_30] : memref<1x128xf32, #tpu.memory_space<vmem>>, vector<1x128xf32>
    %63 = vector.broadcast %62 : vector<1x128xf32> to vector<16x128xf32>
    %64 = arith.addf %61, %63 : vector<16x128xf32>
    %cst_31 = arith.constant 0.000000e+00 : f32
    %65 = vector.broadcast %cst_31 : f32 to vector<16x128xf32>
    %66 = arith.maximumf %64, %65 : vector<16x128xf32>
    %c0_32 = arith.constant 0 : index
    %c0_33 = arith.constant 0 : index
    %c0_34 = arith.constant 0 : index
    %c0_35 = arith.constant 0 : index
    %67 = vector.load %arg12[%c0_32, %c0_33, %c0_34, %c0_35] : memref<1x1x16x128xf32, #tpu.memory_space<vmem>>, vector<1x1x16x128xf32>
    %68 = vector.shape_cast %67 : vector<1x1x16x128xf32> to vector<16x128xf32>
    %69 = vector.shape_cast %66 : vector<16x128xf32> to vector<1x1x16x128xf32>
    tpu.vector_store %arg12[%c0_32, %c0_33, %c0_34, %c0_35], %69 {strides = array<i32>} : memref<1x1x16x128xf32, #tpu.memory_space<vmem>>, vector<1x1x16x128xf32>,
    return
  }
  func.func @transform_0(%arg0: i32, %arg1: i32) -> (i32, i32, i32, i32) {
    %c0_i32 = arith.constant 0 : i32
    %c0_i32_0 = arith.constant 0 : i32
    %c0_i32_1 = arith.constant 0 : i32
    return %arg0, %arg1, %c0_i32, %c0_i32_0 : i32, i32, i32, i32
  }
  func.func @transform_1(%arg0: i32, %arg1: i32) -> (i32, i32) {
    %c0_i32 = arith.constant 0 : i32
    %c0_i32_0 = arith.constant 0 : i32
    %c0_i32_1 = arith.constant 0 : i32
    return %c0_i32, %c0_i32_0 : i32, i32
  }
  func.func @transform_2(%arg0: i32, %arg1: i32) -> (i32, i32) {
    %c0_i32 = arith.constant 0 : i32
    %c0_i32_0 = arith.constant 0 : i32
    %c0_i32_1 = arith.constant 0 : i32
    return %c0_i32, %c0_i32_0 : i32, i32
  }
  func.func @transform_3(%arg0: i32, %arg1: i32) -> (i32, i32) {
    %c0_i32 = arith.constant 0 : i32
    %c0_i32_0 = arith.constant 0 : i32
    %c0_i32_1 = arith.constant 0 : i32
    return %c0_i32, %c0_i32_0 : i32, i32
  }
  func.func @transform_4(%arg0: i32, %arg1: i32) -> (i32, i32, i32) {
    %c0_i32 = arith.constant 0 : i32
    %c0_i32_0 = arith.constant 0 : i32
    %c0_i32_1 = arith.constant 0 : i32
    %c0_i32_2 = arith.constant 0 : i32
    return %c0_i32, %c0_i32_0, %c0_i32_1 : i32, i32, i32
  }
  func.func @transform_5(%arg0: i32, %arg1: i32) -> (i32, i32) {
    %c0_i32 = arith.constant 0 : i32
    %c0_i32_0 = arith.constant 0 : i32
    %c0_i32_1 = arith.constant 0 : i32
    return %c0_i32, %c0_i32_0 : i32, i32
  }
  func.func @transform_6(%arg0: i32, %arg1: i32) -> (i32, i32) {
    %c0_i32 = arith.constant 0 : i32
    %c0_i32_0 = arith.constant 0 : i32
    %c0_i32_1 = arith.constant 0 : i32
    return %c0_i32, %c0_i32_0 : i32, i32
  }
  func.func @transform_7(%arg0: i32, %arg1: i32) -> (i32, i32) {
    %c0_i32 = arith.constant 0 : i32
    %c0_i32_0 = arith.constant 0 : i32
    %c0_i32_1 = arith.constant 0 : i32
    return %c0_i32, %c0_i32_0 : i32, i32
  }
  func.func @transform_8(%arg0: i32, %arg1: i32) -> (i32, i32) {
    %c0_i32 = arith.constant 0 : i32
    %c0_i32_0 = arith.constant 0 : i32
    %c0_i32_1 = arith.constant 0 : i32
    return %c0_i32, %c0_i32_0 : i32, i32
  }
  func.func @transform_9(%arg0: i32, %arg1: i32) -> (i32, i32) {
    %c0_i32 = arith.constant 0 : i32
    %c0_i32_0 = arith.constant 0 : i32
    %c0_i32_1 = arith.constant 0 : i32
    return %c0_i32, %c0_i32_0 : i32, i32
  }
  func.func @transform_10(%arg0: i32, %arg1: i32) -> (i32, i32, i32, i32) {
    %c0_i32 = arith.constant 0 : i32
    %c0_i32_0 = arith.constant 0 : i32
    %c0_i32_1 = arith.constant 0 : i32
    return %arg0, %arg1, %c0_i32, %c0_i32_0 : i32, i32, i32, i32
  }
}

</mosaic_0001>

<bundles_post_ra>
// kernel: tpu_custom_call.1
= control target key start
LH: loop header
LB: loop body
LE: loop exit
PB: predicated region body
PF: predicated region fallthrough
CT: control target
= control target key end

     0   :  { %s2403_s0 = inlined_call_operand.vmem [shape: bf16[2,1,20,128], index: 0, kind: input, shape index: {}]   ;;  %s2404_s1 = inlined_call_operand.hbm [shape: bf16[128,128], index: 1, kind: input, shape index: {}]   ;;  %s2405_s2 = inlined_call_operand.hbm [shape: bf16[128,256], index: 2, kind: input, shape index: {}]   ;;  %s2406_s3 = inlined_call_operand.hbm [shape: bf16[128,128], index: 3, kind: input, shape index: {}]   ;;  %s2407_s4 = inlined_call_operand.hbm [shape: bf16[3,128,128], index: 4, kind: input, shape index: {}]   ;;  %s2408_s5 = inlined_call_operand.vmem [shape: f32[1,128], index: 5, kind: input, shape index: {}]   ;;  %s2409_s6 = inlined_call_operand.vmem [shape: f32[1,128], index: 6, kind: input, shape index: {}]   ;;  %s2410_s7 = inlined_call_operand.vmem [shape: f32[1,128], index: 7, kind: input, shape index: {}]   ;;  %s2411_s8 = inlined_call_operand.vmem [shape: f32[1,128], index: 8, kind: input, shape index: {}]   ;;  %s2412_s9 = inlined_call_operand.vmem [shape: f32[1,128], index: 9, kind: input, shape index: {}]   ;;  %s2413_s10 = inlined_call_operand.hbm [shape: f32[2,1,16,128], index: 10, kind: output, shape index: {}]  }
   0x1   :  { %2428 = sst [smem:[#allocation23_spill]] %s2405_s2 }
   0x2   :  { %2429 = sst [smem:[#allocation24_spill]] %s2413_s10 }
   0x3   :  { %15 = vsyncpa [#allocation3], 0 }
   0x4   :  { %16 = vsyncpa [#allocation6], 0 }
   0x5   :  { %17 = vsyncpa [#allocation9], 0 }
   0x6   :  { %18 = vsyncpa [#allocation4], 0 }
   0x7   :  { %20 = vsyncpa [#allocation4 + $0x1], 0  ;;  %s2112_s13 = smov 0   ;;  %s2114_s14 = smov 0  }
   0x8   :  { %s2116_s15 = smov 0   ;;  %s2118_s16 = smov 0  }
   0x9   :  { %s2120_s17 = smov 0   ;;  %s2122_s18 = smov 0  }
   0xa LB: > { %2430 = sst [smem:[#allocation15_spill]] %s2020_s13  ;;  %s1431_s19 = sadd.s32 4294967295, %s2040_s18   ;;  %s2040_s18 = sphi %s2122_s18, %s26_s18   ;;  %s2036_s17 = sphi %s2120_s17, %s2457_s17   ;;  %s2032_s16 = sphi %s2118_s16, %s2456_s16   ;;  %s2028_s15 = sphi %s2116_s15, %s2455_s15   ;;  %s2024_s14 = sphi %s2114_s14, %s2459_s14   ;;  %s2020_s13 = sphi %s2112_s13, %s2458_s13  }
   0xb   : > { %2431 = sst [smem:[#allocation16_spill]] %s2028_s15  ;;  %s1432_s20 = sadd.s32 4294967294, %s2040_s18  }
   0xc   : > { %2432 = sst [smem:[#allocation17_spill]] %s2036_s17  ;;  %s38_s21 = sadd.s32 1, %s2036_s17 }
   0xd   : > { %2433 = sst [smem:[#allocation18_spill]] %s2040_s18  ;;  %s264_s22 = sadd.s32 1, %s2028_s15 }
   0xe   : > { %p40_p0 = scmp.ge.s32.totalorder %s38_s21, 2  ;;  %p274_p1 = scmp.ne.s32.totalorder %s2028_s15, %s2024_s14 }
   0xf   : > { %p275_p2 = scmp.eq.s32.totalorder %s1431_s19, 1  ;;  %p280_p3 = scmp.ne.s32.totalorder %s2024_s14, %s2020_s13 }
  0x10   : > { %s2461_s21 = smov (%p40_p0, %s38_s21), 0  ;;  %p281_p5 = scmp.eq.s32.totalorder %s1432_s20, 1 }
  0x11   : > { %2434 = sst [smem:[#allocation19_spill]] %s2461_s21  ;;  %p2152_p4 = por %p275_p2, %p274_p1 }
  0x12   : > { %s259_s24 = ssub.s32 %s2036_s17, %s2461_s21  ;;  %p1433_p6 = scmp.ge.s32.totalorder %s2040_s18, 1 }
  0x13   : > { %s2435_s23 = scalar_select %p2152_p4, 1, 0 }
  0x14   : > { %p262_p7 = scmp.eq.s32.totalorder %s259_s24, 0  ;;  %p2159_p8 = por %p281_p5, %p280_p3 }
  0x15   : > { %2436 = sst [smem:[#allocation20_spill]] %s2435_s23  ;;  %p288_p9 = scmp.lt.s32.totalorder %s2040_s18, 3 }
  0x16   : > { %s2437_s25 = scalar_select %p2159_p8, 1, 0 }
  0x17   : > { %s2165_s26 = scalar_select %p262_p7, %s2028_s15, %s264_s22  }
  0x18   : > { %2438 = sst [smem:[#allocation21_spill]] %s2437_s25  ;;  %p2167_p10 = pnand %p1433_p6, %p288_p9 }
  0x19   : > { %2439 = sst [smem:[#allocation22_spill]] %s2165_s26  ;;  %p2171_p11 = scmp.eq.s32.totalorder %s1431_s19, 0 }
  0x1a   : > { %s2440_s27 = scalar_select %p2167_p10, 1, 0 }
  0x1b   : > { %s2441_s28 = scalar_select %p2171_p11, 1, 0 }
  0x1c   : > { %p1684_p12 = pneg %p2167_p10  ;;  %s2042_s29 = smov [#allocation5]  }
  0x1d   : > { %s313_s30 = sshll.u32 %s2042_s29, 4  ;;  %s2043_s12 = smov [#allocation2]   ;;  %s314_s30 = int_to_ptr.vmem [resolvable:$true] %s313_s30 }
  0x1e   : > { %p2179_p13 = pnand %p2171_p11, %p1684_p12  ;;  %s300_s20 = sshll.u32 %s2043_s12, 4  ;;  %s301_s20 = int_to_ptr.vmem [resolvable:$true] %s300_s20 }
  0x1f   : > { %s2443_s2 = sld [smem:[#allocation23_spill]] }
  0x20   : > { %p2191_p1 = pneg %p2179_p13 }
  0x25   : > { %s1838_s19 = scalar_lea.hbm %s2443_s2, 2048 }
  0x26   : > { %p1839_p0 = scmp.ne.s32.totalorder %s2443_s2, %s1838_s19  ;;  %p1845_p5 = scmp.lt.u32.totalorder %s1838_s19, %s2443_s2 }
  0x28   : > { %p1841_p2 = pnand %p2191_p1, %p1839_p0 }
  0x2a   : > { %p1842_p3 = pneg %p1841_p2 }
  0x2c   : > { %p1847_p6 = pnand %p1845_p5, %p1842_p3 }
  0x2e   : > { %1850 = shalt.err (!%p1847_p6)
}
  0x2f   : > { %s1851_s12 = scalar_lea.vmem %s314_s30, 2048  ;;  %p1859_p8 = scmp.lt.s32.totalorder %s314_s30, %s314_s30 }
  0x30   : > { %p1852_p7 = scmp.ne.s32.totalorder %s314_s30, %s1851_s12  ;;  %p1860_p4 = scmp.lt.s32.totalorder %s1851_s12, %s1851_s12 }
  0x32   : > { %p1854_p9 = pnand %p1852_p7, %p2191_p1  ;;  %p1861_p11 = por %p1860_p4, %p1859_p8 }
  0x34   : > { %p1855_p12 = pneg %p1854_p9 }
  0x36   : > { %p1862_p10 = pnand %p1861_p11, %p1855_p12 }
  0x38   : > { %1865 = shalt.err (!%p1862_p10)
}
  0x39   : > { %s2044_s17 = smov 128   ;;  %s2045_s21 = smov 8  }
  0x3a   : > { %1690 = dma.hbm_to_vmem [thread:$0]  (!%p2179_p13), %s2443_s2, 2048, %s314_s30, [#allocation6], %s2044_s17, %s2044_s17, %s2045_s21  }
  0x3b   : > { %s1866_s19 = scalar_lea.hbm %s2404_s1, 1024 }
  0x3c   : > { %p1867_p4 = scmp.ne.s32.totalorder %s2404_s1, %s1866_s19  ;;  %p1873_p11 = scmp.lt.u32.totalorder %s1866_s19, %s2404_s1 }
  0x3e   : > { %p1869_p8 = pnand %p1867_p4, %p2191_p1 }
  0x40   : > { %p1870_p10 = pneg %p1869_p8 }
  0x42   : > { %p1875_p0 = pnand %p1873_p11, %p1870_p10 }
  0x44   : > { %1878 = shalt.err (!%p1875_p0)
}
  0x45   : > { %s1879_s15 = scalar_lea.vmem %s301_s20, 1024  ;;  %p1887_p6 = scmp.lt.s32.totalorder %s301_s20, %s301_s20 }
  0x46   : > { %p1880_p2 = scmp.ne.s32.totalorder %s301_s20, %s1879_s15  ;;  %p1888_p7 = scmp.lt.s32.totalorder %s1879_s15, %s1879_s15 }
  0x48   : > { %p1882_p3 = pnand %p1880_p2, %p2191_p1  ;;  %p1889_p9 = por %p1888_p7, %p1887_p6 }
  0x4a   : > { %p1883_p5 = pneg %p1882_p3 }
  0x4c   : > { %p1890_p12 = pnand %p1889_p9, %p1883_p5 }
  0x4e   : > { %1893 = shalt.err (!%p1890_p12)
}
  0x4f   : > { %s2046_s13 = smov 64   ;;  %s2047_s25 = smov 4  }
  0x50   : > { %1687 = dma.hbm_to_vmem [thread:$0]  (!%p2179_p13), %s2404_s1, 1024, %s301_s20, [#allocation3], %s2046_s13, %s2046_s13, %s2047_s25  }
  0x51   : > { %s2048_s17 = smov [#allocation7]   ;;  %s2049_s26 = smov [#allocation8]  }
  0x52   : > { %s326_s21 = sshll.u32 %s2048_s17, 4  ;;  %s339_s22 = sshll.u32 %s2049_s26, 4  ;;  %s327_s21 = int_to_ptr.vmem [resolvable:$true] %s326_s21  ;;  %s340_s22 = int_to_ptr.vmem [resolvable:$true] %s339_s22 }
  0x53   : > { %s1894_s12 = scalar_lea.hbm %s2406_s3, 1024 }
  0x54   : > { %p1895_p4 = scmp.ne.s32.totalorder %s2406_s3, %s1894_s12  ;;  %p1901_p11 = scmp.lt.u32.totalorder %s1894_s12, %s2406_s3 }
  0x56   : > { %p1897_p8 = pnand %p1895_p4, %p2191_p1 }
  0x58   : > { %p1898_p10 = pneg %p1897_p8 }
  0x5a   : > { %p1903_p0 = pnand %p1901_p11, %p1898_p10 }
  0x5c   : > { %1906 = shalt.err (!%p1903_p0)
}
  0x5d   : > { %s1907_s20 = scalar_lea.vmem %s327_s21, 1024  ;;  %p1915_p6 = scmp.lt.s32.totalorder %s327_s21, %s327_s21 }
  0x5e   : > { %p1908_p2 = scmp.ne.s32.totalorder %s327_s21, %s1907_s20  ;;  %p1916_p7 = scmp.lt.s32.totalorder %s1907_s20, %s1907_s20 }
  0x60   : > { %p1910_p3 = pnand %p1908_p2, %p2191_p1  ;;  %p1917_p9 = por %p1916_p7, %p1915_p6 }
  0x62   : > { %p1911_p5 = pneg %p1910_p3 }
  0x64   : > { %p1918_p12 = pnand %p1917_p9, %p1911_p5 }
  0x66   : > { %1921 = shalt.err (!%p1918_p12)
}
  0x67   : > { %1693 = dma.hbm_to_vmem [thread:$0]  (!%p2179_p13), %s2406_s3, 1024, %s327_s21, [#allocation6], %s2046_s13, %s2046_s13, %s2047_s25  }
  0x68   : > { %s1922_s30 = scalar_lea.hbm %s2407_s4, 3072 }
  0x69   : > { %p1923_p4 = scmp.ne.s32.totalorder %s2407_s4, %s1922_s30  ;;  %p1929_p11 = scmp.lt.u32.totalorder %s1922_s30, %s2407_s4 }
  0x6b   : > { %p1925_p8 = pnand %p1923_p4, %p2191_p1 }
  0x6d   : > { %p1926_p10 = pneg %p1925_p8 }
  0x6f   : > { %p1931_p0 = pnand %p1929_p11, %p1926_p10 }
  0x71   : > { %1934 = shalt.err (!%p1931_p0)
}
  0x72   : > { %s1935_s12 = scalar_lea.vmem %s340_s22, 3072  ;;  %p1943_p6 = scmp.lt.s32.totalorder %s340_s22, %s340_s22 }
  0x73   : > { %p1936_p2 = scmp.ne.s32.totalorder %s340_s22, %s1935_s12  ;;  %p1944_p7 = scmp.lt.s32.totalorder %s1935_s12, %s1935_s12 }
  0x75   : > { %p1938_p3 = pnand %p1936_p2, %p2191_p1  ;;  %p1945_p9 = por %p1944_p7, %p1943_p6 }
  0x77   : > { %p1939_p5 = pneg %p1938_p3 }
  0x79   : > { %p1946_p12 = pnand %p1945_p9, %p1939_p5 }
  0x7b   : > { %1949 = shalt.err (!%p1946_p12)
}
  0x7c   : > { %1696 = dma.hbm_to_vmem [thread:$0]  (!%p2179_p13), %s2407_s4, 3072, %s340_s22, [#allocation9], %s2046_s13, %s2046_s13, %s2047_s25  }
  0x7d   : > { %p2445_p4 = scmp.ne.s32.totalorder %s2440_s27, 0 }
  0x7e   : > { %p2446_p1 = scmp.ne.s32.totalorder (!%p2445_p4), %s2441_s28, 0 }
  0x7f   : > { %382 = sbr.rel (%p2445_p4) target bundleno = 710 (0x2c6), region = 60 }
  0x86   : > { %2003 = dma.done.wait (%p2446_p1), [#allocation3], 1024  }
  0x87   : > { %2005 = vsyncadd (%p2446_p1), [#allocation3], 4294966272 }
  0x88   : > { %2007 = dma.done.wait (%p2446_p1), [#allocation6], 3072  }
  0x89   : > { %2009 = vsyncadd (%p2446_p1), [#allocation6], 4294964224 }
  0x8a   : > { %2011 = dma.done.wait (%p2446_p1), [#allocation9], 3072  }
  0x8b   : > { %2013 = vsyncadd (%p2446_p1), [#allocation9], 4294964224  ;;  %v2050_v0 = vmov 0   ;;  %v1772_v1 = vld [vmem:[#allocation5 + $0x4] ss:$8 sps:$4 sm:$0xff]   ;;  %p436_p13 = scmp.lt.s32.totalorder %s2032_s16, 1 }
  0x8c   : > { %603 = vmatprep.mubr.bf16.mxu0 %v2050_v0  ;;  %v1774_v2 = vld [vmem:[#allocation2] sm:$0xff]   ;;  %571 = vmatprep.subr.bf16.mxu0 %v1772_v1  ;;  %v1776_v4 = vld [vmem:[#allocation5 + $0x14] ss:$8 sps:$4 sm:$0xff]   ;;  %v1778_v5 = vld [vmem:[#allocation2 + $0x8] sm:$0xff]   ;;  %vm473_vm0 = vsmask.f32 7424 }
  0x8d   : > { %v1775_v3 = vld [vmem:[#allocation5] ss:$8 sps:$4 sm:$0xff]   ;;  %1565 = vmatprep.subr.bf16.mxu1 %v1774_v2  ;;  %v1779_v6 = vld [vmem:[#allocation5 + $0x10] ss:$8 sps:$4 sm:$0xff]   ;;  %v1780_v7 = vld [vmem:[#allocation5 + $0x24] ss:$8 sps:$4 sm:$0xff]  }
  0x8e   : > { %572 = vmatpush1.bf16.msra.mxu0 %v1775_v3  ;;  %1566 = vmatpush3.bf16.msra.mxu1 %v1774_v2  ;;  %v1782_v8 = vld [vmem:[#allocation2 + $0x10] sm:$0xff]   ;;  %v1783_v9 = vld [vmem:[#allocation5 + $0x20] ss:$8 sps:$4 sm:$0xff]   ;;  %s437_s27 = scalar_select %p436_p13, %s2032_s16, 1  ;;  %v1786_v11 = vld [vmem:[#allocation2 + $0x18] sm:$0xff]   ;;  %vm752_vm1 = vcmask 1046528  }
  0x8f   : > { %573 = vmatprep.subr.bf16.mxu0 %v1776_v4  ;;  %1567 = vmatprep.subr.bf16.mxu1 %v1778_v5  ;;  %v1784_v10 = vld [vmem:[#allocation5 + $0x34] ss:$8 sps:$4 sm:$0xff]   ;;  %v1787_v12 = vld [vmem:[#allocation5 + $0x30] ss:$8 sps:$4 sm:$0xff]   ;;  %v1788_v13 = vld [vmem:[#allocation5 + $0x44] ss:$8 sps:$4 sm:$0xff]  }
  0x90   : > { %s1665_s28 = smul.u32 12, %s437_s27  ;;  %v1790_v14 = vld [vmem:[#allocation2 + $0x20] sm:$0xff]   ;;  %v1792_v16 = vld [vmem:[#allocation5 + $0x54] ss:$8 sps:$4 sm:$0xff]   ;;  %v1794_v17 = vld [vmem:[#allocation2 + $0x28] sm:$0xff]   ;;  %v2051_v48 = vmov 0.0  }
  0x91   : > { %v1791_v15 = vld [vmem:[#allocation5 + $0x40] ss:$8 sps:$4 sm:$0xff]   ;;  %v1795_v18 = vld [vmem:[#allocation5 + $0x50] ss:$8 sps:$4 sm:$0xff]   ;;  %v1796_v19 = vld [vmem:[#allocation5 + $0x64] ss:$8 sps:$4 sm:$0xff]  }
  0x92   : > { %574 = vmatpush1.bf16.msra.mxu0 %v1779_v6  ;;  %1568 = vmatpush3.bf16.msra.mxu1 %v1778_v5  ;;  %s444_s13 = scalar_lea.vmem %s2403_s0, %s1665_s28  ;;  %v1798_v22 = vld [vmem:[#allocation2 + $0x30] sm:$0xff]   ;;  %v1799_v24 = vld [vmem:[#allocation5 + $0x60] ss:$8 sps:$4 sm:$0xff]   ;;  %v1802_v26 = vld [vmem:[#allocation2 + $0x38] sm:$0xff]   ;;  %vm2052_vm2 = vmmov 0   ;;  %vm2053_vm5 = vmmov 1  }
  0x93   : > { %575 = vmatprep.subr.bf16.mxu0 %v1780_v7  ;;  %1569 = vmatprep.subr.bf16.mxu1 %v1782_v8  ;;  %v1804_v20 = vld [vmem:[%s444_s13] sm:$0xff]   ;;  %v1805_v21 = vld [vmem:[%s444_s13 + $0x8] ss:$0 sps:$4 sm:$0x33]   ;;  %v1800_v25 = vld [vmem:[#allocation5 + $0x74] ss:$8 sps:$4 sm:$0xff]  }
  0x94   : > { %v477_v23 = vshll.u32 %v1804_v20, 16  ;;  %1581 = vmatprep.mubr.bf16.mxu1 %v1804_v20  ;;  %v482_v27 = vshll.u32 %v1805_v21, 16  ;;  %v475_v28 = vshrl.u32 %v1804_v20, 16  ;;  %v1803_v30 = vld [vmem:[#allocation5 + $0x70] ss:$8 sps:$4 sm:$0xff]   ;;  %v1806_v32 = vld [vmem:[#allocation7] sm:$0xff]  }
  0x95   : > { %v486_v33 = vshrl.u32 %v1805_v21, 16  ;;  %v753_v35 = vrot.slane %v1804_v20, 1  ;;  %v754_v36 = vrot.slane %v1805_v21, 1  ;;  %v1807_v37 = vld [vmem:[#allocation7 + $0x8] sm:$0xff]   ;;  %v1808_v39 = vld [vmem:[#allocation7 + $0x10] sm:$0xff]   ;;  %v1809_v41 = vld [vmem:[#allocation7 + $0x18] sm:$0xff]  }
  0x96   : > { %576 = vmatpush1.bf16.msra.mxu0 %v1783_v9  ;;  %1570 = vmatpush3.bf16.msra.mxu1 %v1782_v8  ;;  %v479_v29 = vrot.slane %v477_v23, 1  ;;  %v484_v31 = vrot.slane %v482_v27, 1  ;;  %v1810_v43 = vld [vmem:[#allocation7 + $0x20] sm:$0xff]   ;;  %v1811_v44 = vld [vmem:[#allocation7 + $0x28] sm:$0xff]   ;;  %v1812_v45 = vld [vmem:[#allocation7 + $0x30] sm:$0xff]   ;;  %s433_s18 = sand.u32 1, %s2024_s14  }
  0x97   : > { %577 = vmatprep.subr.bf16.mxu0 %v1784_v10  ;;  %1571 = vmatprep.subr.bf16.mxu1 %v1786_v11  ;;  %v755_v42 = vsel %vm752_vm1, %v753_v35, %v754_v36  ;;  %v1813_v46 = vld [vmem:[#allocation7 + $0x38] sm:$0xff]   ;;  %v1814_v47 = vld [vmem:[#allocation8] sm:$0xff]   ;;  %v1815_v49 = vld [vmem:[#allocation8 + $0x8] sm:$0xff]   ;;  %s1444_s30 = sshll.u32 %s433_s18, 4  ;;  %s2447_s12 = sld [smem:[#allocation20_spill]] }
  0x98   : > { %v480_v34 = vor.u32 %v479_v29, %v475_v28  ;;  %v488_v40 = vor.u32 %v486_v33, %v484_v31  ;;  %v1816_v50 = vld [vmem:[#allocation8 + $0x40] sm:$0xff]   ;;  %v1818_v51 = vld [vmem:[#allocation8 + $0x48] sm:$0xff]   ;;  %v1817_v52 = vld [vmem:[#allocation8 + $0x10] sm:$0xff]   ;;  %s1517_s21 = sshll.u32 %s2032_s16, 8  ;;  %s435_s15 = scalar_lea.vmem [#allocation10], %s1444_s30 }
  0x99   : > { %v1820_v53 = vld [vmem:[#allocation8 + $0x50] sm:$0xff]   ;;  %v1819_v54 = vld [vmem:[#allocation8 + $0x18] sm:$0xff]   ;;  %v1821_v56 = vld [vmem:[#allocation8 + $0x20] sm:$0xff]   ;;  %s1308_s27 = sshll.u32 %s435_s15, 4  ;;  %s2448_s29 = sld [smem:[#allocation24_spill]]  ;;  %s2355_s27 = int_to_ptr.vmem [resolvable:$true] %s1308_s27 }
  0x9a   : > { %578 = vmatpush1.bf16.msra.mxu0 %v1787_v12  ;;  %1572 = vmatpush3.bf16.msra.mxu1 %v1786_v11  ;;  %v485_v38 = vsel %vm473_vm0, %v480_v34, %v484_v31  ;;  %v1822_v55 = vld [vmem:[#allocation8 + $0x58] sm:$0xff]   ;;  %v1823_v57 = vld [vmem:[#allocation8 + $0x28] sm:$0xff]   ;;  %v1824_v58 = vld [vmem:[#allocation8 + $0x60] sm:$0xff]   ;;  %s2357_s25 = scalar_lea.sflag [#allocation4], %s433_s18  ;;  %s1950_s16 = scalar_lea.vmem %s2355_s27, 256 }
  0x9b   : > { %579 = vmatprep.subr.bf16.mxu0 %v1788_v13  ;;  %1573 = vmatprep.subr.bf16.mxu1 %v1790_v14  ;;  %v1825_v59 = vld [vmem:[#allocation8 + $0x30] sm:$0xff]   ;;  %v1826_v60 = vld [vmem:[#allocation8 + $0x68] sm:$0xff]   ;;  %v1827_v61 = vld [vmem:[#allocation8 + $0x38] sm:$0xff]   ;;  %p1951_p8 = scmp.ne.s32.totalorder %s2355_s27, %s1950_s16  ;;  %s2054_s22 = smov [#allocation10]  }
  0x9c   : > { %v1828_v62 = vld [vmem:[#allocation8 + $0x70] sm:$0xff]   ;;  %v1829_v63 = vld [vmem:[#allocation8 + $0x78] sm:$0xff]   ;;  %v1480_v28 = vld [vmem:[%s2408_s5] ss:$0 sm:$0xff]  ;;  %s1954_s20 = sshll.u32 %s2054_s22, 4  ;;  %s1955_s20 = int_to_ptr.vmem [resolvable:$false] %s1954_s20 }
  0x9d   : > { %p2449_p10 = scmp.ne.s32.totalorder %s2447_s12, 0  ;;  %s1956_s2 = scalar_lea.vmem %s1955_s20, 512 }
  0x9e   : > { %580 = vmatpush1.bf16.msra.mxu0 %v1791_v15  ;;  %1574 = vmatpush3.bf16.msra.mxu1 %v1790_v14  ;;  %p1957_p2 = scmp.lt.s32.totalorder %s2355_s27, %s1955_s20  ;;  %p1958_p3 = scmp.lt.s32.totalorder %s1956_s2, %s1950_s16 }
  0x9f   : > { %581 = vmatprep.subr.bf16.mxu0 %v1792_v16  ;;  %1575 = vmatprep.subr.bf16.mxu1 %v1794_v17  ;;  %s2353_s13 = scalar_lea.hbm %s2448_s29, %s1517_s21  ;;  %p1952_p11 = pnand %p1951_p8, %p2449_p10 }
  0xa0   : > { %p1959_p5 = por %p1958_p3, %p1957_p2 }
  0xa1   : > { %p1953_p0 = pneg %p1952_p11 }
  0xa2   : > { %582 = vmatpush1.bf16.msra.mxu0 %v1795_v18  ;;  %1576 = vmatpush3.bf16.msra.mxu1 %v1794_v17 }
  0xa3   : > { %583 = vmatprep.subr.bf16.mxu0 %v1796_v19  ;;  %1577 = vmatprep.subr.bf16.mxu1 %v1798_v22  ;;  %p1960_p6 = pnand %p1959_p5, %p1953_p0 }
  0xa6   : > { %584 = vmatpush1.bf16.msra.mxu0 %v1799_v24  ;;  %1578 = vmatpush3.bf16.msra.mxu1 %v1798_v22  ;;  %v872_v24 = vlaneseq }
  0xa7   : > { %585 = vmatprep.subr.bf16.mxu0 %v1800_v25  ;;  %1579 = vmatprep.subr.bf16.mxu1 %v1802_v26 }
  0xa8   : > { %v873_v25 = vshrl.u32 %v872_v24, 7  ;;  %v1510_v24 = vld [vmem:[%s2411_s8] ss:$0 sm:$0xff] }
  0xaa   : > { %586 = vmatpush1.bf16.msra.mxu0 %v1803_v30  ;;  %1580 = vmatpush3.bf16.msra.mxu1 %v1802_v26  ;;  %v875_v26 = vadd.s32 16, %v873_v25 }
  0xab   : > { %1585 = vmatprep.subr.bf16.mxu0 %v1806_v32  ;;  %1605 = vmatprep.subr.bf16.mxu1 %v2051_v48 }
  0xac   : > { %v879_v29 = vadd.s32 4294967295, %v875_v26 }
  0xad   : > { %604 = vmatmul.mubr.bf16.vlgmr.msra.gmra.mrb[0].mxu0 %v485_v38  ;;  %1582 = vmatmul.mubr.bf16.vlgmr.msra.gmra.mrb[0].mxu1 %v1805_v21 }
  0xae   : > { %1586 = vmatpush3.bf16.msra.mxu0 %v1806_v32  ;;  %613 = vmatprep.mubr.bf16.mxu0 %v2050_v0  ;;  %v1509_v0 = vld [vmem:[%s2409_s6] ss:$0 sm:$0xff]  ;;  %v877_v32 = vadd.s32 4294967295, %v873_v25  ;;  %vm885_vm3 = vcmp.lt.s32.totalorder %v879_v29, 16 }
  0xaf   : > { %1587 = vmatprep.subr.bf16.mxu0 %v1807_v37  ;;  %1606 = vmatpush3.bf16.msra.mxu1 %v1816_v50 }
  0xb0   : > { %1607 = vmatprep.subr.bf16.mxu1 %v2051_v48  ;;  %1621 = vmatprep.mubr.msk.bf16.mxu1 %vm2052_vm2, %v2051_v48  ;;  %vm880_vm4 = vcmp.ge.s32.totalorder %v877_v32, 0 }
  0xb1   : > { %vm1497_vm6 = vmpackc.low %vm2053_vm5, %vm880_vm4 }
  0xb2   : > { %1588 = vmatpush3.bf16.msra.mxu0 %v1807_v37 }
  0xb3   : > { %1589 = vmatprep.subr.bf16.mxu0 %v1808_v39  ;;  %1608 = vmatpush3.bf16.msra.mxu1 %v1818_v51 }
  0xb4   : > { %1609 = vmatprep.subr.bf16.mxu1 %v2051_v48 }
  0xb5   : > { %614 = vmatmul.mubr.bf16.gmra.mrb[4].mxu0 %v488_v40 }
  0xb6   : > { %1590 = vmatpush3.bf16.msra.mxu0 %v1808_v39  ;;  %1601 = vmatprep.mubr.bf16.mxu0 %v755_v42 }
  0xb7   : > { %1591 = vmatprep.subr.bf16.mxu0 %v1809_v41  ;;  %1610 = vmatpush3.bf16.msra.mxu1 %v1820_v53 }
  0xb8   : > { %1611 = vmatprep.subr.bf16.mxu1 %v2051_v48 }
  0xba   : > { %1592 = vmatpush3.bf16.msra.mxu0 %v1809_v41 }
  0xbb   : > { %1593 = vmatprep.subr.bf16.mxu0 %v1810_v43  ;;  %1612 = vmatpush3.bf16.msra.mxu1 %v1822_v55 }
  0xbc   : > { %1613 = vmatprep.subr.bf16.mxu1 %v2051_v48 }
  0xbe   : > { %1594 = vmatpush3.bf16.msra.mxu0 %v1810_v43 }
  0xbf   : > { %1595 = vmatprep.subr.bf16.mxu0 %v1811_v44  ;;  %1614 = vmatpush3.bf16.msra.mxu1 %v1824_v58  ;;  %v1830_v58 = vld [vmem:[#allocation8 + $0x80] sm:$0xff]  }
  0xc0   : > { %1615 = vmatprep.subr.bf16.mxu1 %v2051_v48 }
  0xc2   : > { %1596 = vmatpush3.bf16.msra.mxu0 %v1811_v44 }
  0xc3   : > { %1597 = vmatprep.subr.bf16.mxu0 %v1812_v45  ;;  %1616 = vmatpush3.bf16.msra.mxu1 %v1826_v60  ;;  %v1831_v60 = vld [vmem:[#allocation8 + $0x88] sm:$0xff]  }
  0xc4   : > { %1617 = vmatprep.subr.bf16.mxu1 %v2051_v48 }
  0xc6   : > { %1598 = vmatpush3.bf16.msra.mxu0 %v1812_v45 }
  0xc7   : > { %1599 = vmatprep.subr.bf16.mxu0 %v1813_v46  ;;  %1618 = vmatpush3.bf16.msra.mxu1 %v1828_v62  ;;  %v1833_v62 = vld [vmem:[#allocation8 + $0x98] sm:$0xff]  }
  0xc8   : > { %1619 = vmatprep.subr.bf16.mxu1 %v2051_v48 }
  0xca   : > { %1600 = vmatpush3.bf16.msra.mxu0 %v1813_v46 }
  0xcb   : > { %1625 = vmatprep.subr.bf16.mxu0 %v2051_v48  ;;  %1620 = vmatpush3.bf16.msra.mxu1 %v1829_v63  ;;  %v1834_v63 = vld [vmem:[#allocation8 + $0xa0] sm:$0xff]  }
  0xcc   : > { %1645 = vmatprep.subr.bf16.mxu1 %v2051_v48 }
  0xcd   : > { %1602 = vmatmul.mubr.bf16.vlgmr.msra.gmra.mrb[8].mxu0 %v754_v36 }
  0xce   : > { %1626 = vmatpush3.bf16.msra.mxu0 %v1814_v47  ;;  %1641 = vmatprep.mubr.msk.bf16.mxu0 %vm2052_vm2, %v2051_v48 }
  0xcf   : > { %1627 = vmatprep.subr.bf16.mxu0 %v2051_v48 }
  0xd2   : > { %1628 = vmatpush3.bf16.msra.mxu0 %v1815_v49 }
  0xd3   : > { %1629 = vmatprep.subr.bf16.mxu0 %v2051_v48 }
  0xd6   : > { %1630 = vmatpush3.bf16.msra.mxu0 %v1817_v52 }
  0xd7   : > { %1631 = vmatprep.subr.bf16.mxu0 %v2051_v48 }
  0xda   : > { %1632 = vmatpush3.bf16.msra.mxu0 %v1819_v54 }
  0xdb   : > { %1633 = vmatprep.subr.bf16.mxu0 %v2051_v48 }
  0xde   : > { %1634 = vmatpush3.bf16.msra.mxu0 %v1821_v56 }
  0xdf   : > { %1635 = vmatprep.subr.bf16.mxu0 %v2051_v48 }
  0xe2   : > { %1636 = vmatpush3.bf16.msra.mxu0 %v1823_v57 }
  0xe3   : > { %1637 = vmatprep.subr.bf16.mxu0 %v2051_v48 }
  0xe6   : > { %1638 = vmatpush3.bf16.msra.mxu0 %v1825_v59 }
  0xe7   : > { %1639 = vmatprep.subr.bf16.mxu0 %v2051_v48 }
  0xea   : > { %1640 = vmatpush3.bf16.msra.mxu0 %v1827_v61  ;;  %v1832_v61 = vld [vmem:[#allocation8 + $0x90] sm:$0xff]  }
 0x180   : > { %v605_v1 = vpop.f32.mrb[0].mxu0  ;;  %v1583_v2 = vpop.f32.mrb[0].mxu1 }
 0x181   : > { %v607_v3 = vpop.f32.mrb[1].mxu0  ;;  %v722_v4 = vpop.f32.mrb[1].mxu1 }
 0x182   : > { %v1254_v5 = vadd.f32 %v1509_v0, %v607_v3  ;;  %v723_v6 = vadd.f32 %v722_v4, %v605_v1  ;;  %v609_v7 = vpop.f32.mrb[2].mxu0  ;;  %v1584_v8 = vpop.f32.mrb[2].mxu1  ;;  %v1836_v1 = vld [vmem:[#allocation8 + $0xb0] sm:$0xff]  }
 0x183   : > { %v611_v9 = vpop.f32.mrb[3].mxu0  ;;  %v725_v10 = vpop.f32.mrb[3].mxu1 }
 0x184   : > { %v1255_v11 = vadd.f32 %v1509_v0, %v611_v9  ;;  %v726_v12 = vadd.f32 %v725_v10, %v609_v7  ;;  %v1261_v13 = vrot.slane %v1254_v5, 1 }
 0x186   : > { %v1262_v14 = vrot.slane %v1255_v11, 1 }
 0x188   : > { %v2318_v15 = vsel %vm752_vm1, %v1261_v13, %v1262_v14  ;;  %v615_v16 = vpop.f32.mrb[4].mxu0 }
 0x189   : > { %v731_v17 = vadd.f32 %v1583_v2, %v615_v16  ;;  %v617_v18 = vpop.f32.mrb[5].mxu0  ;;  %v1837_v2 = vld [vmem:[#allocation8 + $0xb8] sm:$0xff]  }
 0x18a   : > { %v1256_v19 = vadd.f32 %v1509_v0, %v617_v18  ;;  %v619_v20 = vpop.f32.mrb[6].mxu0  ;;  %v1835_v0 = vld [vmem:[#allocation8 + $0xa8] sm:$0xff]  }
 0x18b   : > { %v620_v21 = vpop.f32.mrb[7].mxu0 }
 0x18c   : > { %v1264_v22 = vrot.slane %v1256_v19, 1 }
 0x18e   : > { %v2321_v23 = vsel %vm752_vm1, %v1262_v14, %v1264_v22  ;;  %v1508_v14 = vld [vmem:[%s2410_s7] ss:$0 sm:$0xff] }
 0x1a0   : > { %v1603_v27 = vpop.f32.mrb[8].mxu0 }
 0x1a1   : > { %v856_v30 = vadd.f32 %v1603_v27, %v731_v17  ;;  %v840_v31 = vpop.f32.mrb[9].mxu0  ;;  %v1511_v27 = vld [vmem:[%s2412_s9] ss:$0 sm:$0xff] }
 0x1a2   : > { %v854_v33 = vadd.f32 %v840_v31, %v723_v6  ;;  %v1604_v34 = vpop.f32.mrb[10].mxu0 }
 0x1a3   : > { %v866_v35 = vadd.f32 %v1480_v28, %v856_v30  ;;  %v843_v36 = vpop.f32.mrb[11].mxu0 }
 0x1a4   : > { %v864_v37 = vadd.f32 %v1480_v28, %v854_v33  ;;  %v855_v38 = vadd.f32 %v843_v36, %v726_v12 }
 0x1a5   : > { %v869_v39 = vmax.f32 %v866_v35, 0.0 }
 0x1a6   : > { %v867_v40 = vmax.f32 %v864_v37, 0.0  ;;  %v865_v41 = vadd.f32 %v1480_v28, %v855_v38 }
 0x1a7   : > { %v897_v42 = vsel %vm885_vm3, %v869_v39, 0.0 }
 0x1a8   : > { %v899_v43 = vpack.c.bf16 %v897_v42, %v897_v42  ;;  %v895_v44 = vsel %vm880_vm4, %v867_v40, 0.0  ;;  %v868_v45 = vmax.f32 %v865_v41, 0.0 }
 0x1aa   : > { %v898_v46 = vpack.c.bf16 %v868_v45, %v895_v44  ;;  %v1498_v47 = vpack.c.bf16 %v868_v45, %v867_v40  ;;  %v956_v49 = vshll.u32 %v899_v43, 16  ;;  %v1142_v50 = vrot.slane %v899_v43, 1 }
 0x1ac   : > { %v951_v51 = vshll.u32 %v898_v46, 16  ;;  %1642 = vmatmul.mubr.msk.bf16.vlgmr.msra.gmra.mrb[12].mxu0 %vm1497_vm6, %v1498_v47  ;;  %v1141_v52 = vrot.slane %v898_v46, 1  ;;  %v949_v53 = vshrl.u32 %v898_v46, 16  ;;  %v958_v56 = vrot.slane %v956_v49, 1 }
 0x1ae   : > { %v953_v54 = vrot.slane %v951_v51, 1  ;;  %v1143_v55 = vsel %vm752_vm1, %v1141_v52, %v1142_v50 }
 0x1b0   : > { %v954_v57 = vor.u32 %v953_v54, %v949_v53 }
 0x1b2   : > { %v959_v59 = vsel %vm473_vm0, %v954_v57, %v958_v56 }
 0x1b3   : > { %1622 = vmatmul.mubr.bf16.vlgmr.msra.gmra.mrb[4].mxu1 %v959_v59 }
 0x1b4   : > { %1646 = vmatpush3.bf16.msra.mxu1 %v1830_v58  ;;  %1661 = vmatprep.mubr.msk.bf16.mxu1 %vm2052_vm2, %v2051_v48 }
 0x1b5   : > { %1647 = vmatprep.subr.bf16.mxu1 %v2051_v48 }
 0x1b8   : > { %1648 = vmatpush3.bf16.msra.mxu1 %v1831_v60 }
 0x1b9   : > { %1649 = vmatprep.subr.bf16.mxu1 %v2051_v48 }
 0x1bc   : > { %1650 = vmatpush3.bf16.msra.mxu1 %v1832_v61 }
 0x1bd   : > { %1651 = vmatprep.subr.bf16.mxu1 %v2051_v48 }
 0x1c0   : > { %1652 = vmatpush3.bf16.msra.mxu1 %v1833_v62 }
 0x1c1   : > { %1653 = vmatprep.subr.bf16.mxu1 %v2051_v48 }
 0x1c4   : > { %1654 = vmatpush3.bf16.msra.mxu1 %v1834_v63 }
 0x1c5   : > { %1655 = vmatprep.subr.bf16.mxu1 %v2051_v48 }
 0x1c8   : > { %1656 = vmatpush3.bf16.msra.mxu1 %v1835_v0 }
 0x1c9   : > { %1657 = vmatprep.subr.bf16.mxu1 %v2051_v48 }
 0x1cc   : > { %1658 = vmatpush3.bf16.msra.mxu1 %v1836_v1 }
 0x1cd   : > { %1659 = vmatprep.subr.bf16.mxu1 %v2051_v48 }
 0x1d0   : > { %1660 = vmatpush3.bf16.msra.mxu1 %v1837_v2 }
 0x1d3   : > { %1662 = vmatmul.mubr.bf16.vlgmr.msra.gmra.mrb[8].mxu1 %v1143_v55 }
 0x27f   : > { %v1132_v3 = vpop.f32.mrb[12].mxu0 }
 0x280   : > { %v1643_v4 = vpop.f32.mrb[13].mxu0 }
 0x281   : > { %v1135_v5 = vpop.f32.mrb[14].mxu0 }
 0x282   : > { %v1644_v6 = vpop.f32.mrb[15].mxu0 }
 0x286   : > { %v1043_v7 = vpop.f32.mrb[4].mxu1 }
 0x287   : > { %v1133_v8 = vadd.f32 %v1132_v3, %v1043_v7  ;;  %v1623_v9 = vpop.f32.mrb[5].mxu1 }
 0x288   : > { %v1046_v10 = vpop.f32.mrb[6].mxu1 }
 0x289   : > { %v1136_v11 = vadd.f32 %v1135_v5, %v1046_v10  ;;  %v1624_v12 = vpop.f32.mrb[7].mxu1 }
 0x2a6   : > { %v1227_v13 = vpop.f32.mrb[8].mxu1 }
 0x2a7   : > { %v1234_v16 = vadd.f32 %v1227_v13, %v1133_v8  ;;  %v1663_v48 = vpop.f32.mrb[9].mxu1 }
 0x2a8   : > { %v1230_v17 = vpop.f32.mrb[10].mxu1 }
 0x2a9   : > { %v1243_v18 = vadd.f32 %v1508_v14, %v1234_v16  ;;  %v1235_v19 = vadd.f32 %v1230_v17, %v1136_v11  ;;  %v1664_v20 = vpop.f32.mrb[11].mxu1 }
 0x2ab   : > { %v1245_v21 = vmax.f32 %v1243_v18, 0.0  ;;  %v1244_v22 = vadd.f32 %v1508_v14, %v1235_v19 }
 0x2ad   : > { %v1268_v25 = vadd.f32 %v2318_v15, %v1245_v21  ;;  %v1246_v26 = vmax.f32 %v1244_v22, 0.0 }
 0x2af   : > { %v1277_v28 = vmul.f32 %v1510_v24, %v1268_v25  ;;  %v1269_v29 = vadd.f32 %v2321_v23, %v1246_v26 }
 0x2b1   : > { %v1286_v30 = vadd.f32 %v1511_v27, %v1277_v28  ;;  %v1278_v31 = vmul.f32 %v1510_v24, %v1269_v29 }
 0x2b3   : > { %v1288_v32 = vmax.f32 %v1286_v30, 0.0  ;;  %v1287_v33 = vadd.f32 %v1511_v27, %v1278_v31 }
 0x2b5   : > { %1290 = vst [vmem:[%s435_s15] sm:$0xff] %v1288_v32  ;;  %v1289_v15 = vmax.f32 %v1287_v33, 0.0 }
 0x2b7   : > { %1291 = vst [vmem:[%s435_s15 + $0x8] sm:$0xff] %v1289_v15 }
 0x2b8   : > { %1963 = shalt.err (!%p1960_p6)
}
 0x2b9   : > { %s1964_s10 = scalar_lea.hbm %s2353_s13, 256  ;;  %s1968_s30 = scalar_lea.hbm %s2448_s29, 512 }
 0x2ba   : > { %p1965_p7 = scmp.ne.s32.totalorder %s2353_s13, %s1964_s10  ;;  %p1969_p4 = scmp.lt.u32.totalorder %s2353_s13, %s2448_s29 }
 0x2bb   : > { %p1970_p1 = scmp.lt.u32.totalorder %s1968_s30, %s1964_s10  ;;  %p1972_p8 = scmp.lt.u32.totalorder %s1964_s10, %s2353_s13 }
 0x2bc   : > { %p1966_p9 = pnand %p1965_p7, %p2449_p10 }
 0x2bd   : > { %p1971_p13 = por %p1970_p1, %p1969_p4 }
 0x2be   : > { %p1967_p12 = pneg %p1966_p9 }
 0x2bf   : > { %p1973_p11 = por %p1972_p8, %p1971_p13 }
 0x2c1   : > { %p1974_p0 = pnand %p1973_p11, %p1967_p12 }
 0x2c3   : > { %1977 = shalt.err (!%p1974_p0)
}
 0x2c4   : > { %s2055_s24 = smov 128   ;;  %s2056_s19 = smov 8  }
 0x2c5   : > { %1682 = dma.vmem_to_hbm [thread:$0]  (%p2449_p10), %s2355_s27, 256, %s2353_s13, %s2357_s25, %s2055_s24, %s2055_s24, %s2056_s19  }
 0x2c6 PF: > { %s2450_s21 = sld [smem:[#allocation18_spill]]  ;;  %s2451_s15 = sld [smem:[#allocation15_spill]] }
 0x2c7   : > { %s2452_s28 = sld [smem:[#allocation21_spill]] }
 0x2cc   : > { %p1709_p2 = scmp.ge.s32.totalorder %s2450_s21, 2  ;;  %s1323_s11 = sand.u32 1, %s2451_s15  }
 0x2cd   : > { %p2453_p3 = scmp.ne.s32.totalorder %s2452_s28, 0  ;;  %s1324_s16 = scalar_lea.sflag [#allocation4], %s1323_s11 }
 0x2cf   : > { %p1698_p5 = pnand %p1709_p2, %p2453_p3 }
 0x2d1   : > { %2015 = dma.done.wait (!%p1698_p5), %s1324_s16, 256  }
 0x2d2   : > { %2017 = vsyncadd (!%p1698_p5), %s1324_s16, 4294967040  ;;  %s26_s18 = sadd.s32 1, %s2450_s21   ;;  %s2454_s22 = sld [smem:[#allocation16_spill]] }
 0x2d3   : > { %p23_p6 = scmp.ge.s32.totalorder %s26_s18, 4   ;;  %s2455_s15 = sld [smem:[#allocation22_spill]] }
 0x2d4   : > { %s2456_s16 = sld [smem:[#allocation17_spill]]  ;;  %s2457_s17 = sld [smem:[#allocation19_spill]] }
 0x2d5   : > { %s2458_s13 = smov %s2024_s14  ;;  %25 = sbr.rel (!%p23_p6) target bundleno = 10 (0xa), region = 112 }
 0x2d8   : > { %s2459_s14 = smov %s2454_s22 }
 0x2dc   :  { %1329 = vsyncpa [#allocation3], 1 }
 0x2dd   :  { %1331 = vsyncpa [#allocation3 + $0x1], 1 }
 0x2de   :  { %1332 = vsyncpa [#allocation6], 1 }
 0x2df   :  { %1333 = vsyncpa [#allocation9], 1 }
 0x2e0   :  { %1334 = vsyncpa [#allocation4], 1 }
 0x2e1   :  { %1336 = vsyncpa [#allocation4 + $0x1], 1 }

</bundles_post_ra>
